<compile_context>
chip_gen: v5e
topology: v5e:2x2
jax: 0.10.0
libtpu: 0.0.40
codegen_flags: <defaults>
</compile_context>

<pallas_src>
import functools

import jax
import jax.numpy as jnp
from jax import lax
from jax.experimental import pallas as pl
from jax.experimental.pallas import tpu as pltpu


def _loss_kernel(yl_ref, fn_ref, fa_ref, out_ref, acc_ref, *,
                 n_total, tile_n, num_tiles, k, d, kmajor, needs_mask,
                 alpha, beta, lambda1, lambda2, margin):
    step = pl.program_id(0)

    @pl.when(step == 0)
    def _():
        acc_ref[0] = 0.0   # sum over rows of relu(margin - ||mean_a - mean_n||_2)
        acc_ref[1] = 0.0   # sum over rows*d of log1p(relu(var_a - var_n))

    def ksl(ref, kk):
        """One K-slice of the current N-tile as an (tile_n, d) f32 array."""
        if kmajor:
            return ref[kk].astype(jnp.float32)                    # (tile_n, d)
        # Reshaped (N, K*D) layout: static column slice.  d % 128 == 0 on this
        # path, so every slice offset is lane-tile aligned (free).
        return ref[:, kk * d:(kk + 1) * d].astype(jnp.float32)

    # ---- pass 1: means over K (K is tiny, static Python loop) ----
    sum_a = ksl(fa_ref, 0)
    sum_n = ksl(fn_ref, 0)
    for kk in range(1, k):
        sum_a = sum_a + ksl(fa_ref, kk)
        sum_n = sum_n + ksl(fn_ref, kk)
    inv_k = 1.0 / k
    mean_a = sum_a * inv_k                                        # (tile_n, d)
    mean_n = sum_n * inv_k

    # ---- pass 2: centered sums of squares (two-pass unbiased variance) ----
    da = ksl(fa_ref, 0) - mean_a
    dn = ksl(fn_ref, 0) - mean_n
    ssd_a = da * da
    ssd_n = dn * dn
    for kk in range(1, k):
        da = ksl(fa_ref, kk) - mean_a
        dn = ksl(fn_ref, kk) - mean_n
        ssd_a = ssd_a + da * da
        ssd_n = ssd_n + dn * dn

    inv_km1 = 1.0 / (k - 1)
    var_diff = (ssd_a - ssd_n) * inv_km1                          # var_a - var_n
    var_log = jnp.log1p(jnp.maximum(var_diff, 0.0))               # (tile_n, d)

    md = mean_a - mean_n
    mean_diff = jnp.sqrt(jnp.sum(md * md, axis=1, keepdims=True))  # (tile_n, 1)
    hinge = jnp.maximum(margin - mean_diff, 0.0)

    if needs_mask:
        # Last tile may run past n_total; zero out the padded (garbage) rows.
        rows = step * tile_n + lax.broadcasted_iota(jnp.int32, (tile_n, 1), 0)
        valid = rows < n_total
        var_log = jnp.where(valid, var_log, 0.0)
        hinge = jnp.where(valid, hinge, 0.0)

    acc_ref[0] += jnp.sum(hinge)
    acc_ref[1] += jnp.sum(var_log)

    # ---- finalize: tiny BCE + combine, once on the last step ----
    @pl.when(step == num_tiles - 1)
    def _():
        yp = yl_ref[0:1, :].astype(jnp.float32)                   # (1, 2B)
        lab = yl_ref[1:2, :].astype(jnp.float32)
        # torch.nn.BCELoss clamps each log term at -100
        log_p = jnp.maximum(jnp.log(yp), -100.0)
        log_1mp = jnp.maximum(jnp.log(1.0 - yp), -100.0)
        loss_cls = jnp.mean(-(lab * log_p + (1.0 - lab) * log_1mp))

        mean_loss = acc_ref[0] / n_total
        variance_loss_log = acc_ref[1] / (n_total * d)
        loss_dual = alpha * mean_loss + beta * variance_loss_log
        out_ref[0, 0] = lambda1 * loss_cls + lambda2 * loss_dual


# Conservative per-step VMEM budget for the two feature blocks (x2 pipeline
# buffers each): fits well under every generation's scoped-VMEM default
# (16/32 MiB), so no vmem_limit_bytes override is needed on any path.
_VMEM_TILE_BUDGET = 8 * 1024 * 1024


def _pick_tile_n(n_total, bytes_per_row, max_rows_per_tile=None):
    cap = max(8, _VMEM_TILE_BUDGET // max(1, 4 * bytes_per_row))
    if max_rows_per_tile is not None:
        cap = min(cap, max_rows_per_tile)
    if cap >= n_total:
        return n_total, 1                       # whole problem in one grid step
    tile = max(8, (cap // 8) * 8)               # sublane-aligned row tiles
    return tile, pl.cdiv(n_total, tile)


def my_loss_pallas(y_pred_normal, y_pred_abnormal, nlabel, alabel,
                   feat_n, feat_a, *, alpha, beta, lambda1, lambda2, margin,
                   max_rows_per_tile=None):
    # Predictions + labels merged into a single tiny (2, 2B) input (one DMA).
    yl = jnp.stack([
        jnp.concatenate([y_pred_normal.reshape(-1),
                         y_pred_abnormal.reshape(-1)], axis=0),
        jnp.concatenate([nlabel.reshape(-1), alabel.reshape(-1)], axis=0),
    ], axis=0).astype(jnp.float32)

    n_total, k, d = feat_a.shape
    assert feat_n.shape == feat_a.shape
    itemsize = jnp.dtype(feat_a.dtype).itemsize

    kmajor = (d % 128) != 0
    if kmajor:
        # Fallback for odd D: K-major transpose keeps each K-slice lane-dense.
        fn_in = jnp.transpose(feat_n, (1, 0, 2))   # (K, N, D)
        fa_in = jnp.transpose(feat_a, (1, 0, 2))
    else:
        # Fast path (production D = 2048): metadata-only row-major collapse,
        # no extra HBM copy, no extra launch.
        fn_in = feat_n.reshape(n_total, k * d)
        fa_in = feat_a.reshape(n_total, k * d)

    tile_n, num_tiles = _pick_tile_n(n_total, k * d * itemsize, max_rows_per_tile)
    needs_mask = (n_total % tile_n) != 0

    if kmajor:
        feat_spec = pl.BlockSpec((k, tile_n, d), lambda i: (0, i, 0))
    else:
        feat_spec = pl.BlockSpec((tile_n, k * d), lambda i: (i, 0))

    kernel = functools.partial(
        _loss_kernel, n_total=n_total, tile_n=tile_n, num_tiles=num_tiles,
        k=k, d=d, kmajor=kmajor, needs_mask=needs_mask,
        alpha=float(alpha), beta=float(beta),
        lambda1=float(lambda1), lambda2=float(lambda2), margin=float(margin))

    cost = pl.CostEstimate(
        flops=16 * n_total * k * d,
        transcendentals=n_total * (d + 1),
        bytes_accessed=2 * n_total * k * d * itemsize + yl.size * 4)

    out = pl.pallas_call(
        kernel,
        out_shape=jax.ShapeDtypeStruct((1, 1), jnp.float32),
        grid_spec=pltpu.PrefetchScalarGridSpec(
            num_scalar_prefetch=0,
            grid=(num_tiles,),
            in_specs=[
                pl.BlockSpec(yl.shape, lambda i: (0, 0)),
                feat_spec,
                feat_spec,
            ],
            out_specs=pl.BlockSpec(memory_space=pltpu.SMEM),
            scratch_shapes=[pltpu.SMEM((2,), jnp.float32)],
        ),
        compiler_params=pltpu.CompilerParams(
            dimension_semantics=("arbitrary",)),
        cost_estimate=cost,
    )(yl, fn_in, fa_in)
    return out[0, 0]


def my_loss_ref(y_pred_normal, y_pred_abnormal, nlabel, alabel,
                feat_n, feat_a, *, alpha, beta, lambda1, lambda2, margin):
    """Pure-JAX reference matching the PyTorch forward (returned value only)."""
    y_pred = jnp.concatenate([y_pred_normal, y_pred_abnormal], 0).squeeze()
    label = jnp.concatenate([nlabel, alabel], 0)
    lp = jnp.maximum(jnp.log(y_pred), -100.0)
    l1p = jnp.maximum(jnp.log(1.0 - y_pred), -100.0)
    loss_cls = jnp.mean(-(label * lp + (1.0 - label) * l1p))
    mean_a = jnp.mean(feat_a, axis=1)
    mean_n = jnp.mean(feat_n, axis=1)
    var_a = jnp.var(feat_a, axis=1, ddof=1)
    var_n = jnp.var(feat_n, axis=1, ddof=1)
    variance_loss_log = jnp.mean(jnp.log1p(jnp.maximum(var_a - var_n, 0.0)))
    mean_diff = jnp.sqrt(jnp.sum((mean_a - mean_n) ** 2, axis=1))
    mean_loss = jnp.mean(jnp.maximum(margin - mean_diff, 0.0))
    loss_dual = alpha * mean_loss + beta * variance_loss_log
    return lambda1 * loss_cls + lambda2 * loss_dual


if __name__ == "__main__":
    # Hyperparameters of My_loss.__init__ (no learned weights in this module).
    hp = dict(alpha=0.1, beta=0.1, lambda1=1.0, lambda2=1.0, margin=100.0)

    key = jax.random.PRNGKey(0)
    k0, k1, k2, k3 = jax.random.split(key, 4)
    B = 4   # videos per branch -> y_pred_* : (4, 1), labels : (4,)

    def make_inputs(n, kk, dd, dtype=jnp.float32):
        ypn = jax.nn.sigmoid(jax.random.normal(k0, (B, 1), jnp.float32))
        ypa = jax.nn.sigmoid(jax.random.normal(k1, (B, 1), jnp.float32))
        nl = jnp.zeros((B,), jnp.float32)
        al = jnp.ones((B,), jnp.float32)
        fn = jax.random.normal(k2, (n, kk, dd), jnp.float32)
        fa = 2.0 * jax.random.normal(k3, (n, kk, dd), jnp.float32) + 1.0
        return ypn, ypa, nl, al, fn.astype(dtype), fa.astype(dtype)

    # 1) fast path: D % 128 == 0, reshape(N, K*D), single grid step
    args = make_inputs(8, 3, 256)
    out = jax.block_until_ready(my_loss_pallas(*args, **hp))
    ref = my_loss_ref(*args, **hp)
    assert jnp.allclose(out, ref, rtol=1e-5, atol=1e-5), ("fast", out, ref)

    # 2) fallback path: D % 128 != 0 -> K-major layout
    args = make_inputs(8, 3, 32)
    out = jax.block_until_ready(my_loss_pallas(*args, **hp))
    ref = my_loss_ref(*args, **hp)
    assert jnp.allclose(out, ref, rtol=1e-5, atol=1e-5), ("kmajor", out, ref)

    # 3) N-tiled grid path with a partial (row-masked) last tile
    args = make_inputs(20, 3, 256)
    out = jax.block_until_ready(my_loss_pallas(*args, max_rows_per_tile=8, **hp))
    ref = my_loss_ref(*args, **hp)
    assert jnp.allclose(out, ref, rtol=1e-5, atol=1e-5), ("tiled", out, ref)

    # 4) bf16 features: halves HBM traffic; widening to f32 happens in-kernel
    args = make_inputs(8, 3, 256, dtype=jnp.bfloat16)
    out = jax.block_until_ready(my_loss_pallas(*args, **hp))
    ref_args = args[:4] + (args[4].astype(jnp.float32), args[5].astype(jnp.float32))
    ref = my_loss_ref(*ref_args, **hp)
    assert jnp.allclose(out, ref, rtol=1e-4, atol=1e-4), ("bf16", out, ref)

    print("KERNEL_OK")
</pallas_src>

<mosaic_0001>
module attributes {stable_mosaic.version = 11 : i64} {
  func.func @_loss_kernel(%arg0: i32, %arg1: memref<2x8xf32, #tpu.memory_space<vmem>>, %arg2: memref<8x768xf32, #tpu.memory_space<vmem>>, %arg3: memref<8x768xf32, #tpu.memory_space<vmem>>, %arg4: memref<1x1xf32, #tpu.memory_space<smem>>, %arg5: memref<2xf32, #tpu.memory_space<smem>>) attributes {dimension_semantics = [#tpu.dimension_semantics<arbitrary>], iteration_bounds = array<i64: 1>, scalar_prefetch = 0 : i64, scratch_operands = 1 : i64, tpu.core_type = #tpu.core_type<tc>, window_params = [{pipeline_mode = #tpu.pipeline_mode<synchronous>, transform_indices = @transform_0, window_bounds = array<i64: 2, 8>}, {transform_indices = @transform_1, window_bounds = array<i64: 8, 768>}, {transform_indices = @transform_2, window_bounds = array<i64: 8, 768>}, {transform_indices = @transform_3, window_bounds = array<i64: 1, 1>}]} {
    %c0_i32 = arith.constant 0 : i32
    %0 = arith.cmpi eq, %arg0, %c0_i32 : i32
    %1 = arith.extui %0 : i1 to i32
    %c0_i32_0 = arith.constant 0 : i32
    %2 = arith.cmpi ne, %1, %c0_i32_0 : i32
    scf.if %2 {
      %cst_35 = arith.constant 0.000000e+00 : f32
      %c0_36 = arith.constant 0 : index
      %71 = memref.load %arg5[%c0_36] : memref<2xf32, #tpu.memory_space<smem>>
      memref.store %cst_35, %arg5[%c0_36] : memref<2xf32, #tpu.memory_space<smem>>
      %cst_37 = arith.constant 0.000000e+00 : f32
      %c1_38 = arith.constant 1 : index
      %72 = memref.load %arg5[%c1_38] : memref<2xf32, #tpu.memory_space<smem>>
      memref.store %cst_37, %arg5[%c1_38] : memref<2xf32, #tpu.memory_space<smem>>
    } else {
    }
    %c0 = arith.constant 0 : index
    %c0_1 = arith.constant 0 : index
    %3 = vector.load %arg3[%c0, %c0_1] : memref<8x768xf32, #tpu.memory_space<vmem>>, vector<8x256xf32>
    %c0_2 = arith.constant 0 : index
    %c0_3 = arith.constant 0 : index
    %4 = vector.load %arg2[%c0_2, %c0_3] : memref<8x768xf32, #tpu.memory_space<vmem>>, vector<8x256xf32>
    %c0_4 = arith.constant 0 : index
    %c256 = arith.constant 256 : index
    %5 = vector.load %arg3[%c0_4, %c256] : memref<8x768xf32, #tpu.memory_space<vmem>>, vector<8x256xf32>
    %6 = arith.addf %3, %5 : vector<8x256xf32>
    %c0_5 = arith.constant 0 : index
    %c256_6 = arith.constant 256 : index
    %7 = vector.load %arg2[%c0_5, %c256_6] : memref<8x768xf32, #tpu.memory_space<vmem>>, vector<8x256xf32>
    %8 = arith.addf %4, %7 : vector<8x256xf32>
    %c0_7 = arith.constant 0 : index
    %c512 = arith.constant 512 : index
    %9 = vector.load %arg3[%c0_7, %c512] : memref<8x768xf32, #tpu.memory_space<vmem>>, vector<8x256xf32>
    %10 = arith.addf %6, %9 : vector<8x256xf32>
    %c0_8 = arith.constant 0 : index
    %c512_9 = arith.constant 512 : index
    %11 = vector.load %arg2[%c0_8, %c512_9] : memref<8x768xf32, #tpu.memory_space<vmem>>, vector<8x256xf32>
    %12 = arith.addf %8, %11 : vector<8x256xf32>
    %cst = arith.constant 0.333333343 : f32
    %13 = vector.broadcast %cst : f32 to vector<8x256xf32>
    %14 = arith.mulf %10, %13 : vector<8x256xf32>
    %cst_10 = arith.constant 0.333333343 : f32
    %15 = vector.broadcast %cst_10 : f32 to vector<8x256xf32>
    %16 = arith.mulf %12, %15 : vector<8x256xf32>
    %c0_11 = arith.constant 0 : index
    %c0_12 = arith.constant 0 : index
    %17 = vector.load %arg3[%c0_11, %c0_12] : memref<8x768xf32, #tpu.memory_space<vmem>>, vector<8x256xf32>
    %18 = arith.subf %17, %14 : vector<8x256xf32>
    %c0_13 = arith.constant 0 : index
    %c0_14 = arith.constant 0 : index
    %19 = vector.load %arg2[%c0_13, %c0_14] : memref<8x768xf32, #tpu.memory_space<vmem>>, vector<8x256xf32>
    %20 = arith.subf %19, %16 : vector<8x256xf32>
    %21 = arith.mulf %18, %18 : vector<8x256xf32>
    %22 = arith.mulf %20, %20 : vector<8x256xf32>
    %c0_15 = arith.constant 0 : index
    %c256_16 = arith.constant 256 : index
    %23 = vector.load %arg3[%c0_15, %c256_16] : memref<8x768xf32, #tpu.memory_space<vmem>>, vector<8x256xf32>
    %24 = arith.subf %23, %14 : vector<8x256xf32>
    %c0_17 = arith.constant 0 : index
    %c256_18 = arith.constant 256 : index
    %25 = vector.load %arg2[%c0_17, %c256_18] : memref<8x768xf32, #tpu.memory_space<vmem>>, vector<8x256xf32>
    %26 = arith.subf %25, %16 : vector<8x256xf32>
    %27 = arith.mulf %24, %24 : vector<8x256xf32>
    %28 = arith.addf %21, %27 : vector<8x256xf32>
    %29 = arith.mulf %26, %26 : vector<8x256xf32>
    %30 = arith.addf %22, %29 : vector<8x256xf32>
    %c0_19 = arith.constant 0 : index
    %c512_20 = arith.constant 512 : index
    %31 = vector.load %arg3[%c0_19, %c512_20] : memref<8x768xf32, #tpu.memory_space<vmem>>, vector<8x256xf32>
    %32 = arith.subf %31, %14 : vector<8x256xf32>
    %c0_21 = arith.constant 0 : index
    %c512_22 = arith.constant 512 : index
    %33 = vector.load %arg2[%c0_21, %c512_22] : memref<8x768xf32, #tpu.memory_space<vmem>>, vector<8x256xf32>
    %34 = arith.subf %33, %16 : vector<8x256xf32>
    %35 = arith.mulf %32, %32 : vector<8x256xf32>
    %36 = arith.addf %28, %35 : vector<8x256xf32>
    %37 = arith.mulf %34, %34 : vector<8x256xf32>
    %38 = arith.addf %30, %37 : vector<8x256xf32>
    %39 = arith.subf %36, %38 : vector<8x256xf32>
    %cst_23 = arith.constant 5.000000e-01 : f32
    %40 = vector.broadcast %cst_23 : f32 to vector<8x256xf32>
    %41 = arith.mulf %39, %40 : vector<8x256xf32>
    %cst_24 = arith.constant 0.000000e+00 : f32
    %42 = vector.broadcast %cst_24 : f32 to vector<8x256xf32>
    %43 = arith.maximumf %41, %42 : vector<8x256xf32>
    %44 = math.log1p %43 : vector<8x256xf32>
    %45 = arith.subf %14, %16 : vector<8x256xf32>
    %46 = arith.mulf %45, %45 : vector<8x256xf32>
    %cst_25 = arith.constant dense<0.000000e+00> : vector<8xf32>
    %47 = vector.multi_reduction <add>, %46, %cst_25 [1] : vector<8x256xf32> to vector<8xf32>
    %48 = vector.shape_cast %47 : vector<8xf32> to vector<8x1xf32>
    %49 = math.sqrt %48 : vector<8x1xf32>
    %cst_26 = arith.constant 1.000000e+02 : f32
    %50 = vector.broadcast %cst_26 : f32 to vector<8x1xf32>
    %51 = arith.subf %50, %49 : vector<8x1xf32>
    %cst_27 = arith.constant 0.000000e+00 : f32
    %52 = vector.broadcast %cst_27 : f32 to vector<8x1xf32>
    %53 = arith.maximumf %51, %52 : vector<8x1xf32>
    %c0_28 = arith.constant 0 : index
    %54 = memref.load %arg5[%c0_28] : memref<2xf32, #tpu.memory_space<smem>>
    %55 = vector.shape_cast %53 : vector<8x1xf32> to vector<1x8x1xf32>
    %cst_29 = arith.constant dense<0.000000e+00> : vector<1xf32>
    %56 = vector.multi_reduction <add>, %55, %cst_29 [1, 2] : vector<1x8x1xf32> to vector<1xf32>
    %57 = vector.shape_cast %56 : vector<1xf32> to vector<1x1x1xf32>
    %58 = vector.extract %57[0, 0, 0] : f32 from vector<1x1x1xf32>
    %59 = arith.addf %54, %58 : f32
    %c0_30 = arith.constant 0 : index
    %60 = memref.load %arg5[%c0_30] : memref<2xf32, #tpu.memory_space<smem>>
    memref.store %59, %arg5[%c0_30] : memref<2xf32, #tpu.memory_space<smem>>
    %c1 = arith.constant 1 : index
    %61 = memref.load %arg5[%c1] : memref<2xf32, #tpu.memory_space<smem>>
    %62 = vector.shape_cast %44 : vector<8x256xf32> to vector<1x8x256xf32>
    %cst_31 = arith.constant dense<0.000000e+00> : vector<1xf32>
    %63 = vector.multi_reduction <add>, %62, %cst_31 [1, 2] : vector<1x8x256xf32> to vector<1xf32>
    %64 = vector.shape_cast %63 : vector<1xf32> to vector<1x1x1xf32>
    %65 = vector.extract %64[0, 0, 0] : f32 from vector<1x1x1xf32>
    %66 = arith.addf %61, %65 : f32
    %c1_32 = arith.constant 1 : index
    %67 = memref.load %arg5[%c1_32] : memref<2xf32, #tpu.memory_space<smem>>
    memref.store %66, %arg5[%c1_32] : memref<2xf32, #tpu.memory_space<smem>>
    %c0_i32_33 = arith.constant 0 : i32
    %68 = arith.cmpi eq, %arg0, %c0_i32_33 : i32
    %69 = arith.extui %68 : i1 to i32
    %c0_i32_34 = arith.constant 0 : i32
    %70 = arith.cmpi ne, %69, %c0_i32_34 : i32
    scf.if %70 {
      %c0_35 = arith.constant 0 : index
      %c0_36 = arith.constant 0 : index
      %71 = vector.load %arg1[%c0_35, %c0_36] : memref<2x8xf32, #tpu.memory_space<vmem>>, vector<1x8xf32>
      %c1_37 = arith.constant 1 : index
      %c0_38 = arith.constant 0 : index
      %72 = vector.load %arg1[%c1_37, %c0_38] : memref<2x8xf32, #tpu.memory_space<vmem>>, vector<1x8xf32>
      %73 = math.log %71 : vector<1x8xf32>
      %cst_39 = arith.constant -1.000000e+02 : f32
      %74 = vector.broadcast %cst_39 : f32 to vector<1x8xf32>
      %75 = arith.maximumf %73, %74 : vector<1x8xf32>
      %cst_40 = arith.constant 1.000000e+00 : f32
      %76 = vector.broadcast %cst_40 : f32 to vector<1x8xf32>
      %77 = arith.subf %76, %71 : vector<1x8xf32>
      %78 = math.log %77 : vector<1x8xf32>
      %cst_41 = arith.constant -1.000000e+02 : f32
      %79 = vector.broadcast %cst_41 : f32 to vector<1x8xf32>
      %80 = arith.maximumf %78, %79 : vector<1x8xf32>
      %81 = arith.mulf %72, %75 : vector<1x8xf32>
      %cst_42 = arith.constant 1.000000e+00 : f32
      %82 = vector.broadcast %cst_42 : f32 to vector<1x8xf32>
      %83 = arith.subf %82, %72 : vector<1x8xf32>
      %84 = arith.mulf %83, %80 : vector<1x8xf32>
      %85 = arith.addf %81, %84 : vector<1x8xf32>
      %cst_43 = arith.constant 0.000000e+00 : f32
      %86 = vector.broadcast %cst_43 : f32 to vector<1x8xf32>
      %87 = arith.subf %86, %85 : vector<1x8xf32>
      %88 = vector.shape_cast %87 : vector<1x8xf32> to vector<1x1x8xf32>
      %cst_44 = arith.constant dense<0.000000e+00> : vector<1xf32>
      %89 = vector.multi_reduction <add>, %88, %cst_44 [1, 2] : vector<1x1x8xf32> to vector<1xf32>
      %90 = vector.shape_cast %89 : vector<1xf32> to vector<1x1x1xf32>
      %91 = vector.extract %90[0, 0, 0] : f32 from vector<1x1x1xf32>
      %cst_45 = arith.constant 8.000000e+00 : f32
      %92 = arith.divf %91, %cst_45 : f32
      %c0_46 = arith.constant 0 : index
      %93 = memref.load %arg5[%c0_46] : memref<2xf32, #tpu.memory_space<smem>>
      %cst_47 = arith.constant 8.000000e+00 : f32
      %94 = arith.divf %93, %cst_47 : f32
      %c1_48 = arith.constant 1 : index
      %95 = memref.load %arg5[%c1_48] : memref<2xf32, #tpu.memory_space<smem>>
      %cst_49 = arith.constant 2.048000e+03 : f32
      %96 = arith.divf %95, %cst_49 : f32
      %cst_50 = arith.constant 1.000000e-01 : f32
      %97 = arith.mulf %cst_50, %94 : f32
      %cst_51 = arith.constant 1.000000e-01 : f32
      %98 = arith.mulf %cst_51, %96 : f32
      %99 = arith.addf %97, %98 : f32
      %cst_52 = arith.constant 1.000000e+00 : f32
      %100 = arith.mulf %cst_52, %92 : f32
      %cst_53 = arith.constant 1.000000e+00 : f32
      %101 = arith.mulf %cst_53, %99 : f32
      %102 = arith.addf %100, %101 : f32
      %c0_54 = arith.constant 0 : index
      %c0_55 = arith.constant 0 : index
      %103 = memref.load %arg4[%c0_54, %c0_55] : memref<1x1xf32, #tpu.memory_space<smem>>
      memref.store %102, %arg4[%c0_54, %c0_55] : memref<1x1xf32, #tpu.memory_space<smem>>
    } else {
    }
    return
  }
  func.func @transform_0(%arg0: i32) -> (i32, i32) {
    %c0_i32 = arith.constant 0 : i32
    %c0_i32_0 = arith.constant 0 : i32
    %c0_i32_1 = arith.constant 0 : i32
    return %c0_i32, %c0_i32_0 : i32, i32
  }
  func.func @transform_1(%arg0: i32) -> (i32, i32) {
    %c0_i32 = arith.constant 0 : i32
    %c0_i32_0 = arith.constant 0 : i32
    return %arg0, %c0_i32 : i32, i32
  }
  func.func @transform_2(%arg0: i32) -> (i32, i32) {
    %c0_i32 = arith.constant 0 : i32
    %c0_i32_0 = arith.constant 0 : i32
    return %arg0, %c0_i32 : i32, i32
  }
  func.func @transform_3(%arg0: i32) -> (i32, i32) {
    %c0_i32 = arith.constant 0 : i32
    %c0_i32_0 = arith.constant 0 : i32
    %c0_i32_1 = arith.constant 0 : i32
    return %c0_i32, %c0_i32_0 : i32, i32
  }
}

</mosaic_0001>

<bundles_post_ra>
// kernel: tpu_custom_call.1
= control target key start
LH: loop header
LB: loop body
LE: loop exit
PB: predicated region body
PF: predicated region fallthrough
CT: control target
= control target key end

     0   :  { %8 = vsyncpa [#allocation4], 0  ;;  %s434_s0 = inlined_call_operand.hbm [shape: f32[2,8], index: 0, kind: input, shape index: {}]   ;;  %s435_s1 = inlined_call_operand.hbm [shape: f32[8,768], index: 1, kind: input, shape index: {}]   ;;  %s436_s2 = inlined_call_operand.hbm [shape: f32[8,768], index: 2, kind: input, shape index: {}]   ;;  %s437_s3 = inlined_call_operand.hbm [shape: f32[1,1], index: 3, kind: output, shape index: {}]  }
   0x1   :  { %9 = vsyncpa [#allocation7], 0  ;;  %s27_s14 = sshll.u32 %s435_s1, 4  ;;  %s28_s14 = int_to_ptr.hbm [resolvable:$true] %s27_s14 }
   0x2   :  { %10 = vsyncpa [#allocation5], 0  ;;  %s396_s15 = smov [#allocation6]   ;;  %s16_s19 = sshll.u32 %s434_s0, 4  ;;  %s17_s19 = int_to_ptr.hbm [resolvable:$true] %s16_s19 }
   0x3   :  { %s29_s16 = sshll.u32 %s396_s15, 4  ;;  %s397_s20 = smov [#allocation3]   ;;  %s30_s16 = int_to_ptr.vmem [resolvable:$true] %s29_s16 }
   0x4   :  { %32 = dma.hbm_to_vmem [thread:$0]  %s28_s14, 768, %s30_s16, [#allocation7]  }
   0x5   :  { %s18_s21 = sshll.u32 %s397_s20, 4  ;;  %s38_s24 = sshll.u32 %s436_s2, 4  ;;  %s19_s21 = int_to_ptr.vmem [resolvable:$true] %s18_s21  ;;  %s39_s24 = int_to_ptr.hbm [resolvable:$true] %s38_s24 }
   0x6   :  { %21 = dma.hbm_to_vmem [thread:$0]  %s17_s19, 32, %s19_s21, [#allocation4]  }
   0x7   :  { %s398_s1 = smov [#allocation8]  }
   0x8   :  { %s40_s25 = sshll.u32 %s398_s1, 4  ;;  %s41_s25 = int_to_ptr.vmem [resolvable:$true] %s40_s25 }
   0x9   :  { %43 = dma.hbm_to_vmem [thread:$0]  %s39_s24, 768, %s41_s25, [#allocation7]  }
   0xa   :  { %390 = dma.done.wait [#allocation4], 32  }
   0xb   :  { %391 = vsyncadd [#allocation4], 4294967264 }
   0xc   :  { %392 = dma.done.wait [#allocation7], 1536  }
   0xd   :  { %393 = vsyncadd [#allocation7], 4294965760  ;;  %v64_v0 = vld [vmem:[#allocation8] sm:$0xff]  ;;  %v65_v1 = vld [vmem:[#allocation8 + $0x8] sm:$0xff]  ;;  %vm211_vm2 = vcmask 57344   ;;  %vm166_vm5 = vcmask 7168  }
   0xe   :  { %v66_v2 = vld [vmem:[#allocation6] sm:$0xff]  ;;  %v67_v3 = vld [vmem:[#allocation6 + $0x8] sm:$0xff]  ;;  %v72_v8 = vld [vmem:[#allocation6 + $0x10] sm:$0xff]  ;;  %s262_s8 = sshll.u32 %s437_s3, 4  ;;  %s401_s12 = smov [#allocation9]   ;;  %s263_s8 = int_to_ptr.hbm [resolvable:$true] %s262_s8 }
   0xf   :  { %v68_v4 = vld [vmem:[#allocation8 + $0x10] sm:$0xff]  ;;  %v69_v5 = vld [vmem:[#allocation8 + $0x18] sm:$0xff]  ;;  %v73_v9 = vld [vmem:[#allocation6 + $0x18] sm:$0xff]  ;;  %v74_v11 = vadd.f32 %v72_v8, %v66_v2 }
  0x10   :  { %v70_v6 = vadd.f32 %v68_v4, %v64_v0  ;;  %v71_v7 = vadd.f32 %v69_v5, %v65_v1  ;;  %v76_v10 = vld [vmem:[#allocation8 + $0x20] sm:$0xff]  ;;  %v75_v12 = vadd.f32 %v73_v9, %v67_v3  ;;  %v77_v13 = vld [vmem:[#allocation8 + $0x28] sm:$0xff]  ;;  %v80_v14 = vld [vmem:[#allocation6 + $0x20] sm:$0xff] }
  0x11   :  { %v81_v15 = vld [vmem:[#allocation6 + $0x28] sm:$0xff]  ;;  %v82_v18 = vadd.f32 %v80_v14, %v74_v11 }
  0x12   :  { %v78_v16 = vadd.f32 %v76_v10, %v70_v6  ;;  %v79_v17 = vadd.f32 %v77_v13, %v71_v7  ;;  %v83_v19 = vadd.f32 %v81_v15, %v75_v12 }
  0x13   :  { %v86_v22 = vmul.f32 0.33333334, %v82_v18  ;;  %v198_v18 = vld [vmem:[#allocation3 + $0x1] sm:$0x1] }
  0x14   :  { %v84_v20 = vmul.f32 0.33333334, %v78_v16  ;;  %v85_v21 = vmul.f32 0.33333334, %v79_v17  ;;  %v87_v23 = vmul.f32 0.33333334, %v83_v19 }
  0x15   :  { %v90_v28 = vsub.f32 %v66_v2, %v86_v22  ;;  %v98_v30 = vsub.f32 %v72_v8, %v86_v22  ;;  %v110_v32 = vsub.f32 %v80_v14, %v86_v22 }
  0x16   :  { %v89_v24 = vsub.f32 %v65_v1, %v85_v21  ;;  %v97_v25 = vsub.f32 %v69_v5, %v85_v21  ;;  %v109_v26 = vsub.f32 %v77_v13, %v85_v21  ;;  %v88_v27 = vsub.f32 %v64_v0, %v84_v20  ;;  %v197_v5 = vld [vmem:[#allocation3] sm:$0x1] }
  0x17   :  { %v91_v29 = vsub.f32 %v67_v3, %v87_v23  ;;  %v99_v31 = vsub.f32 %v73_v9, %v87_v23  ;;  %v111_v33 = vsub.f32 %v81_v15, %v87_v23  ;;  %v144_v34 = vsub.f32 %v84_v20, %v86_v22 }
  0x18   :  { %v145_v35 = vsub.f32 %v85_v21, %v87_v23  ;;  %v96_v36 = vsub.f32 %v68_v4, %v84_v20  ;;  %v108_v37 = vsub.f32 %v76_v10, %v84_v20  ;;  %v93_v41 = vmul.f32 %v89_v24, %v89_v24 }
  0x19   :  { %v146_v38 = vmul.f32 %v144_v34, %v144_v34  ;;  %v94_v42 = vmul.f32 %v90_v28, %v90_v28  ;;  %v95_v43 = vmul.f32 %v91_v29, %v91_v29  ;;  %v101_v44 = vmul.f32 %v97_v25, %v97_v25 }
  0x1a   :  { %v147_v39 = vmul.f32 %v145_v35, %v145_v35  ;;  %v104_v45 = vmul.f32 %v98_v30, %v98_v30  ;;  %v105_v46 = vmul.f32 %v99_v31, %v99_v31  ;;  %v92_v47 = vmul.f32 %v88_v27, %v88_v27 }
  0x1b   :  { %v100_v48 = vmul.f32 %v96_v36, %v96_v36  ;;  %v113_v49 = vmul.f32 %v109_v26, %v109_v26  ;;  %v116_v50 = vmul.f32 %v110_v32, %v110_v32  ;;  %v117_v51 = vmul.f32 %v111_v33, %v111_v33 }
  0x1c   :  { %v148_v40 = vadd.f32 %v147_v39, %v146_v38  ;;  %v112_v52 = vmul.f32 %v108_v37, %v108_v37  ;;  %v103_v54 = vadd.f32 %v101_v44, %v93_v41  ;;  %v106_v55 = vadd.f32 %v104_v45, %v94_v42 }
  0x1d   :  { %v102_v53 = vadd.f32 %v100_v48, %v92_v47  ;;  %v107_v56 = vadd.f32 %v105_v46, %v95_v43  ;;  %v202_v6 = vsub.f32 1.0, %v197_v5  ;;  %v207_v26 = vsub.f32 1.0, %v198_v18 }
  0x1e   :  { %149 = vadd.xlane.f32.xlu0 %v148_v40  ;;  %v115_v58 = vadd.f32 %v113_v49, %v103_v54  ;;  %v118_v59 = vadd.f32 %v116_v50, %v106_v55  ;;  %v399_v50 = vmov 8.0  }
  0x1f   :  { %v114_v57 = vadd.f32 %v112_v52, %v102_v53  ;;  %v119_v60 = vadd.f32 %v117_v51, %v107_v56  ;;  %v400_v51 = vmov 2048.0  }
  0x21   :  { %v120_v61 = vsub.f32 %v114_v57, %v118_v59  ;;  %v121_v62 = vsub.f32 %v115_v58, %v119_v60 }
  0x23   :  { %v122_v63 = vmul.f32 0.5, %v120_v61  ;;  %v123_v0 = vmul.f32 0.5, %v121_v62 }
  0x25   :  { %v124_v1 = vmax.f32 %v122_v63, 0.0  ;;  %v125_v2 = vmax.f32 %v123_v0, 0.0 }
  0x27   :  { %v126_v3 = vadd.f32 1.0, %v124_v1  ;;  %v135_v4 = vadd.f32 1.0, %v125_v2  ;;  %v129_v7 = vmul.f32 -0.5, %v124_v1  ;;  %v138_v8 = vmul.f32 -0.5, %v125_v2 }
  0x28   :  { %v132_v12 = vand.u32 2147483647, %v124_v1  ;;  %v141_v13 = vand.u32 2147483647, %v125_v2 }
  0x29   :  { %292 = vlog2.f32 %v126_v3  ;;  %v130_v9 = vadd.f32 1.0, %v129_v7  ;;  %v139_v10 = vadd.f32 1.0, %v138_v8 }
  0x2a   :  { %294 = vlog2.f32 %v135_v4  ;;  %vm133_vm0 = vcmp.lt.f32.partialorder %v132_v12, 0.0004427343  ;;  %vm142_vm1 = vcmp.lt.f32.partialorder %v141_v13, 0.0004427343 }
  0x2b   :  { %296 = vlog2.f32 %v197_v5  ;;  %v131_v16 = vmul.f32 %v130_v9, %v124_v1  ;;  %v140_v17 = vmul.f32 %v139_v10, %v125_v2 }
  0x2c   :  { %298 = vlog2.f32 %v202_v6 }
  0x2f   :  { %v293_v11 = vpop.eup %292 }
  0x30   :  { %v295_v14 = vpop.eup %294  ;;  %v128_v15 = vmul.f32 0.6931472, %v293_v11 }
  0x31   :  { %v297_v19 = vpop.eup %296  ;;  %v137_v20 = vmul.f32 0.6931472, %v295_v14 }
  0x32   :  { %v299_v21 = vpop.eup %298  ;;  %v134_v22 = vsel %vm133_vm0, %v131_v16, %v128_v15  ;;  %v200_v23 = vmul.f32 0.6931472, %v297_v19 }
  0x33   :  { %v143_v24 = vsel %vm142_vm1, %v140_v17, %v137_v20  ;;  %v204_v25 = vmul.f32 0.6931472, %v299_v21 }
  0x34   :  { %v181_v27 = vadd.f32 %v143_v24, %v134_v22  ;;  %v201_v28 = vmax.f32 %v200_v23, -100.0 }
  0x35   :  { %v205_v29 = vmax.f32 %v204_v25, -100.0 }
  0x36   :  { %182 = vadd.xlane.f32.xlu1 %v181_v27  ;;  %v206_v30 = vmul.f32 %v201_v28, %v198_v18 }
  0x37   :  { %v208_v31 = vmul.f32 %v207_v26, %v205_v29 }
  0x39   :  { %v209_v32 = vadd.f32 %v208_v31, %v206_v30 }
  0x3b   :  { %v210_v33 = vsub.f32 0.0, %v209_v32 }
  0x3d   :  { %v212_v34 = vsel %vm211_vm2, %v210_v33, 0.0 }
  0x3e   :  { %213 = vadd.xlane.f32.xlu1 %v212_v34 }
  0x91   :  { %v150_v35 = vpop.xlane.xlu0 %149 }
  0x92   :  { %300 = vrsqrt.f32 %v150_v35  ;;  %vm158_vm3 = vcmp.eq.f32.partialorder %v150_v35, inf  ;;  %v161_v43 = vand.u32 2147483648, %v150_v35  ;;  %vm160_vm4 = vcmp.eq.f32.partialorder %v150_v35, 0.0 }
  0x93   :  { %302 = vrcp.f32 %v399_v50 }
  0x94   :  { %304 = vrcp.f32 %v400_v51 }
  0x98   :  { %v301_v36 = vpop.eup %300 }
  0x99   :  { %v152_v37 = vmul.f32 %v301_v36, %v150_v35  ;;  %v303_v55 = vpop.eup %302 }
  0x9a   :  { %v305_v56 = vpop.eup %304  ;;  %v223_v59 = vmul.f32 8.0, %v303_v55  ;;  %vm227_vm6 = vweird.f32 %v303_v55 }
  0x9b   :  { %v153_v38 = vmul.f32 %v301_v36, %v152_v37  ;;  %v243_v60 = vmul.f32 2048.0, %v305_v56  ;;  %vm247_vm7 = vweird.f32 %v305_v56 }
  0x9c   :  { %v224_v1 = vsub.f32 1.0, %v223_v59 }
  0x9d   :  { %v154_v39 = vmul.f32 0.5, %v153_v38  ;;  %v244_v2 = vsub.f32 1.0, %v243_v60 }
  0x9e   :  { %v225_v7 = vmul.f32 %v303_v55, %v224_v1 }
  0x9f   :  { %v155_v40 = vsub.f32 1.5, %v154_v39  ;;  %v245_v8 = vmul.f32 %v305_v56, %v244_v2 }
  0xa0   :  { %v226_v13 = vadd.f32 %v303_v55, %v225_v7 }
  0xa1   :  { %v156_v41 = vmul.f32 %v301_v36, %v155_v40  ;;  %v246_v14 = vadd.f32 %v305_v56, %v245_v8 }
  0xa2   :  { %v228_v18 = vsel %vm227_vm6, %v303_v55, %v226_v13 }
  0xa3   :  { %v157_v42 = vmul.f32 %v156_v41, %v150_v35  ;;  %v248_v19 = vsel %vm247_vm7, %v305_v56, %v246_v14 }
  0xa5   :  { %v159_v44 = vsel %vm158_vm3, %v150_v35, %v157_v42 }
  0xa6   :  { %v162_v45 = vsel %vm160_vm4, %v161_v43, %v159_v44 }
  0xa7   :  { %v163_v46 = vsub.f32 100.0, %v162_v45 }
  0xa9   :  { %v164_v47 = vmax.f32 %v163_v46, 0.0  ;;  %v183_v49 = vpop.xlane.xlu1 %182 }
  0xaa   :  { %v184_v53 = vrot.slane %v183_v49, 4 }
  0xab   :  { %v167_v48 = vsel %vm166_vm5, %v164_v47, 0.0 }
  0xac   :  { %168 = vadd.xlane.f32.xlu0 %v167_v48  ;;  %v185_v57 = vadd.f32 %v184_v53, %v183_v49 }
  0xae   :  { %v186_v61 = vrot.slane %v185_v57, 2 }
  0xb0   :  { %v187_v4 = vadd.f32 %v186_v61, %v185_v57 }
  0xb1   :  { %v214_v52 = vpop.xlane.xlu1 %213 }
  0xb2   :  { %v215_v54 = vrot.slane %v214_v52, 4  ;;  %v188_v10 = vrot.slane %v187_v4, 1 }
  0xb4   :  { %v216_v58 = vadd.f32 %v215_v54, %v214_v52  ;;  %v189_v16 = vadd.f32 %v188_v10, %v187_v4 }
  0xb6   :  { %v217_v63 = vrot.slane %v216_v58, 2 }
  0xb8   :  { %v218_v5 = vadd.f32 %v217_v63, %v216_v58 }
  0xba   :  { %v219_v12 = vrot.slane %v218_v5, 1 }
  0xbc   :  { %v220_v17 = vadd.f32 %v219_v12, %v218_v5 }
 0x11f   :  { %v169_v62 = vpop.xlane.xlu0 %168 }
 0x120   :  { %v170_v0 = vrot.slane %v169_v62, 4 }
 0x122   :  { %v171_v3 = vadd.f32 %v170_v0, %v169_v62 }
 0x124   :  { %v172_v6 = vrot.slane %v171_v3, 2 }
 0x126   :  { %v173_v9 = vadd.f32 %v172_v6, %v171_v3 }
 0x128   :  { %v174_v11 = vrot.slane %v173_v9, 1 }
 0x12a   :  { %v175_v15 = vadd.f32 %v174_v11, %v173_v9 }
 0x12c   :  { %276 = vpush %v175_v15 }
 0x12d   :  { %278 = vpush %v189_v16 }
 0x12e   :  { %280 = vpush %v220_v17 }
 0x12f   :  { %282 = vpush %v228_v18 }
 0x130   :  { %284 = vpush %v248_v19 }
 0x15d   :  { %s277_s0 = spop %276 }
 0x15e   :  { %s279_s2 = spop %278 }
 0x15f   :  { %s281_s26 = spop %280 }
 0x160   :  { %s283_s27 = spop %282 }
 0x161   :  { %s285_s28 = spop %284  ;;  %s240_s29 = smul.f32 %s283_s27, %s277_s0 }
 0x162   :  { %s250_s30 = smul.f32 %s285_s28, %s279_s2 }
 0x163   :  { %s251_s4 = smul.f32 0.1, %s240_s29 }
 0x164   :  { %s252_s5 = smul.f32 0.1, %s250_s30 }
 0x165   :  { %s230_s9 = smul.f32 %s283_s27, %s281_s26 }
 0x166   :  { %s253_s10 = sadd.f32 %s252_s5, %s251_s4 }
 0x168   :  { %s254_s11 = sadd.f32 %s253_s10, %s230_s9 }
 0x16a   :  { %256 = sst [smem:[#allocation9]] %s254_s11 }
 0x16b   :  { %265 = dma.smem_to_hbm %s401_s12, 16, %s263_s8, [#allocation5]  }
 0x16c   :  { %394 = dma.done.wait [#allocation5], 16  }
 0x16d   :  { %395 = vsyncadd [#allocation5], 4294967280 }
 0x16e   :  { %270 = sfence }
 0x16f   :  { %271 = vsyncpa [#allocation4], 1 }
 0x170   :  { %272 = vsyncpa [#allocation7], 1 }
 0x171   :  { %273 = vsyncpa [#allocation5], 1 }

</bundles_post_ra>
